<compile_context>
chip_gen: v5e
topology: v5e:2x2
jax: 0.10.0
libtpu: 0.0.40
codegen_flags: <defaults>
</compile_context>

<pallas_src>
import functools

import jax
import jax.numpy as jnp
from jax.experimental import pallas as pl
from jax.experimental.pallas import tpu as pltpu

ALPHA = 0.5
BETA = 0.3

_LANES = 128


def _round_up(x, m):
    return ((x + m - 1) // m) * m


def _cdiv(a, b):
    return (a + b - 1) // b


def _tile_plan(T, F, itemsize):
    """Generation-aware (T_tile, F_tile, vmem_limit_bytes)."""
    F_pad = _round_up(F, _LANES)
    try:
        vmem_cap = int(getattr(pltpu.get_tpu_info(), "vmem_capacity_bytes",
                               64 * 1024 * 1024))
    except Exception:  # unknown chip / interpret mode -> be conservative
        vmem_cap = 64 * 1024 * 1024

    if vmem_cap <= 64 * 1024 * 1024:
        # v7x-class: 64 MiB VMEM per TensorCore.  Footprint is
        # 2 inputs x 2 pipeline buffers = 4x the tile, plus small outputs.
        tile_target = 4 * 1024 * 1024
        vmem_limit = 48 * 1024 * 1024
    else:
        # v5e / v6e: 128 MiB physical VMEM -> bigger tiles amortize the
        # ~0.35us per-grid-step overhead further.
        tile_target = 8 * 1024 * 1024
        vmem_limit = 64 * 1024 * 1024

    budget_elems = max(tile_target // itemsize, 8 * _LANES)

    if T * _LANES * itemsize <= tile_target:
        # Whole time axis fits in a tile even at minimal lane width: no
        # T-tiling; make the tile as lane-wide as the byte budget allows
        # (no artificial lane cap).
        T_tile = T
        F_tile = min(F_pad, max(_LANES, (budget_elems // T) // _LANES * _LANES))
    else:
        # Long sequence: tile T (multiple of 8) and keep lanes moderately wide
        # so DMAs stay lane-dense and efficient.
        F_tile = min(F_pad, 4 * _LANES)
        T_tile = max(8, (budget_elems // F_tile) // 8 * 8)

    # v7x megacore: the F axis is the "parallel" one -- keep >= 2 tiles when
    # possible so both TensorCores get work (harmless on 1-TC v5e/v6e).
    if _cdiv(F_pad, F_tile) < 2 and F_pad >= 2 * _LANES:
        F_tile = _round_up(_cdiv(F_pad, 2), _LANES)

    return T_tile, F_tile, vmem_limit


def _gal_partial_kernel(pred_ref, target_ref, out_ref, carry_ref, *, T, F):
    """Per-(F-tile, T-tile) partial sums.

    out_ref rows (accumulated across the T grid axis):
      row 0: sum_T diff^2                 (MSE partial, per lane)
      row 1: sum_T |diff| / (|t|+1e-6)    (relative-error partial, per lane)
      row 2: sum_T (diff[i+1]-diff[i])^2  (temporal-gradient partial, per lane)
    """
    T_tile, F_tile = pred_ref.shape
    f = pl.program_id(0)
    t = pl.program_id(1)

    # Upcast in-register; HBM stays in the native dtype.
    p = pred_ref[...].astype(jnp.float32)
    tg = target_ref[...].astype(jnp.float32)

    # Validity masks against the true (unpadded) extents.  Boundary blocks may
    # contain unspecified data (there is no wrapper-side padding), so both
    # inputs must be masked before use.
    lane_ids = jax.lax.broadcasted_iota(jnp.int32, (1, F_tile), 1)
    lane_ok = lane_ids + f * F_tile < F                       # (1, F_tile)
    local_rows = jax.lax.broadcasted_iota(jnp.int32, (T_tile, 1), 0)
    row_ids = local_rows + t * T_tile                         # global T index
    row_ok = row_ids < T                                      # (T_tile, 1)
    valid = jnp.logical_and(lane_ok, row_ok)                  # (T_tile, F_tile)

    p = jnp.where(valid, p, 0.0)
    tg = jnp.where(valid, tg, 0.0)
    diff = p - tg                                             # 0 where invalid

    # ---- MSE / relative-error per-lane partial sums -------------------------
    abs_t = jnp.abs(tg) + 1e-6
    recip = pl.reciprocal(abs_t, approx=True)   # EUP seed (separate slot)
    recip = recip * (2.0 - abs_t * recip)       # one Newton step -> ~f32 exact
    mse_row = jnp.sum(diff * diff, axis=0, keepdims=True)            # (1, F_tile)
    rel_row = jnp.sum(jnp.abs(diff) * recip, axis=0, keepdims=True)  # (1, F_tile)

    # ---- in-block temporal gradient -----------------------------------------
    if T_tile > 1:
        # shifted[i] = diff[(i+1) % T_tile]  (XLU sublane roll, aligned shape)
        shifted = pltpu.roll(diff, shift=T_tile - 1, axis=0)
        gdiff = shifted - diff
        # A pair (i, i+1) is valid iff i+1 is inside this block and inside the
        # true T extent (this also drops the cyclic wrap row).
        pair_ok = jnp.logical_and(local_rows < T_tile - 1, row_ids + 1 < T)
        grad_row = jnp.sum(jnp.where(pair_ok, gdiff * gdiff, 0.0),
                           axis=0, keepdims=True)                    # (1, F_tile)
    else:
        grad_row = jnp.zeros((1, F_tile), jnp.float32)

    # ---- accumulate into the resident output block --------------------------
    @pl.when(t == 0)
    def _init():
        out_ref[...] = jnp.zeros_like(out_ref)

    out_ref[0:1, :] += mse_row
    out_ref[1:2, :] += rel_row
    out_ref[2:3, :] += grad_row

    # Cross-T-block gradient pair: (last row of previous block, first row here).
    @pl.when(t > 0)
    def _cross():
        cross = diff[0:1, :] - carry_ref[...]
        out_ref[2:3, :] += cross * cross

    # Carry this block's last diff row (only consumed if a next T block exists;
    # non-final blocks are always fully valid rows, so no masking is needed).
    carry_ref[...] = diff[T_tile - 1:T_tile, :]


def gradient_aware_loss(pred, target, alpha=ALPHA, beta=BETA,
                        *, t_tile=None, f_tile=None):
    """Pallas implementation of GradientAwareLoss.forward(pred, target)."""
    assert pred.shape == target.shape
    T = pred.shape[0]
    F = 1
    for d in pred.shape[1:]:
        F *= d
    p2 = pred.reshape(T, F)
    t2 = target.reshape(T, F)
    itemsize = jnp.dtype(p2.dtype).itemsize

    T_tile, F_tile, vmem_limit = _tile_plan(T, F, itemsize)
    if t_tile is not None:            # test/override hook
        assert t_tile == T or (t_tile % 8 == 0 and t_tile <= T)
        T_tile = t_tile
    if f_tile is not None:            # test/override hook
        assert f_tile % _LANES == 0
        F_tile = f_tile

    num_t = _cdiv(T, T_tile)
    num_f = _cdiv(_round_up(F, _LANES), F_tile)
    F_out = num_f * F_tile

    cost = pl.CostEstimate(
        flops=int(20 * T * F),
        transcendentals=int(T * F),
        bytes_accessed=int(2 * T * F * itemsize + 3 * F_out * 4),
    )

    out = pl.pallas_call(
        functools.partial(_gal_partial_kernel, T=T, F=F),
        out_shape=jax.ShapeDtypeStruct((3, F_out), jnp.float32),
        grid=(num_f, num_t),
        in_specs=[
            pl.BlockSpec((T_tile, F_tile), lambda f, t: (t, f)),
            pl.BlockSpec((T_tile, F_tile), lambda f, t: (t, f)),
        ],
        out_specs=pl.BlockSpec((3, F_tile), lambda f, t: (0, f)),
        scratch_shapes=[pltpu.VMEM((1, F_tile), jnp.float32)],
        compiler_params=pltpu.CompilerParams(
            dimension_semantics=("parallel", "arbitrary"),
            vmem_limit_bytes=vmem_limit,
        ),
        cost_estimate=cost,
    )(p2, t2)

    # Tiny final cross-lane reduce + normalization with the true counts.
    # Masked lanes / rows contributed exactly 0 to every partial row.
    n_elems = jnp.float32(T * F)
    n_grad = jnp.float32((T - 1) * F)   # T == 1 -> 0/0 = NaN, matches reference
    mse_loss = jnp.sum(out[0]) / n_elems
    rel_loss = jnp.sum(out[1]) / n_elems
    grad_loss = jnp.sum(out[2]) / n_grad
    return mse_loss + alpha * rel_loss + beta * grad_loss


def _reference_loss(pred, target, alpha=ALPHA, beta=BETA):
    pred = pred.astype(jnp.float32)
    target = target.astype(jnp.float32)
    diff = pred - target
    mse_loss = jnp.mean(diff * diff)
    rel_loss = jnp.mean(jnp.abs(diff) / (jnp.abs(target) + 1e-6))
    pg = pred[1:] - pred[:-1]
    tg = target[1:] - target[:-1]
    grad_loss = jnp.mean((pg - tg) ** 2)
    return mse_loss + alpha * rel_loss + beta * grad_loss


if __name__ == "__main__":
    key = jax.random.PRNGKey(0)
    k1, k2, k3, k4, k5, k6 = jax.random.split(key, 6)

    # Case 1: T=8, trailing (4, 16) -> F=64 (< 128): single lane tile with
    # in-kernel F-boundary masking (no jnp.pad anywhere).
    pred = jax.random.normal(k1, (8, 4, 16), dtype=jnp.float32)
    target = jax.random.normal(k2, (8, 4, 16), dtype=jnp.float32)
    loss = jax.block_until_ready(gradient_aware_loss(pred, target))
    ref = jax.block_until_ready(_reference_loss(pred, target))
    assert jnp.allclose(loss, ref, rtol=2e-5, atol=1e-5), (loss, ref)

    # Case 2: wider trailing dims (F=2560) -> multi-tile "parallel" F grid
    # (split across both TensorCores on v7x).
    pred2 = jax.random.normal(k3, (8, 64, 40), dtype=jnp.float32)
    target2 = jax.random.normal(k4, (8, 64, 40), dtype=jnp.float32)
    loss2 = jax.block_until_ready(gradient_aware_loss(pred2, target2))
    ref2 = jax.block_until_ready(_reference_loss(pred2, target2))
    assert jnp.allclose(loss2, ref2, rtol=2e-5, atol=1e-5), (loss2, ref2)

    # Case 3: forced T-tiling (T=20, T_tile=8) exercises the accumulator
    # output, the cross-block gradient carry, and T- and F-boundary masking
    # (the same path long sequences take with natural tile sizing).
    pred3 = jax.random.normal(k5, (20, 3, 13), dtype=jnp.float32)
    target3 = jax.random.normal(k6, (20, 3, 13), dtype=jnp.float32)
    loss3 = jax.block_until_ready(gradient_aware_loss(pred3, target3, t_tile=8))
    ref3 = jax.block_until_ready(_reference_loss(pred3, target3))
    assert jnp.allclose(loss3, ref3, rtol=2e-5, atol=1e-5), (loss3, ref3)

    print("KERNEL_OK")
</pallas_src>

<mosaic_0001>
module attributes {stable_mosaic.version = 11 : i64} {
  func.func @_gal_partial_kernel(%arg0: i32, %arg1: i32, %arg2: memref<8x128xf32, #tpu.memory_space<vmem>>, %arg3: memref<8x128xf32, #tpu.memory_space<vmem>>, %arg4: memref<3x128xf32, #tpu.memory_space<vmem>>, %arg5: memref<1x128xf32, #tpu.memory_space<vmem>>) attributes {dimension_semantics = [#tpu.dimension_semantics<parallel>, #tpu.dimension_semantics<arbitrary>], iteration_bounds = array<i64: 1, 1>, scalar_prefetch = 0 : i64, scratch_operands = 1 : i64, tpu.core_type = #tpu.core_type<tc>, window_params = [{transform_indices = @transform_0, window_bounds = array<i64: 8, 128>}, {transform_indices = @transform_1, window_bounds = array<i64: 8, 128>}, {transform_indices = @transform_2, window_bounds = array<i64: 3, 128>}]} {
    %c0 = arith.constant 0 : index
    %c0_0 = arith.constant 0 : index
    %0 = vector.load %arg2[%c0, %c0_0] : memref<8x128xf32, #tpu.memory_space<vmem>>, vector<8x128xf32>
    %c0_1 = arith.constant 0 : index
    %c0_2 = arith.constant 0 : index
    %1 = vector.load %arg3[%c0_1, %c0_2] : memref<8x128xf32, #tpu.memory_space<vmem>>, vector<8x128xf32>
    %2 = tpu.iota {dimensions = array<i32: 1>} : vector<1x128xi32>
    %c128_i32 = arith.constant 128 : i32
    %3 = arith.muli %arg0, %c128_i32 : i32
    %4 = vector.broadcast %3 : i32 to vector<1x128xi32>
    %5 = arith.addi %2, %4 : vector<1x128xi32>
    %c64_i32 = arith.constant 64 : i32
    %6 = vector.broadcast %c64_i32 : i32 to vector<1x128xi32>
    %7 = arith.cmpi slt, %5, %6 : vector<1x128xi32>
    %8 = tpu.iota {dimensions = array<i32: 0>} : vector<8x1xi32>
    %c8_i32 = arith.constant 8 : i32
    %9 = arith.muli %arg1, %c8_i32 : i32
    %10 = vector.broadcast %9 : i32 to vector<8x1xi32>
    %11 = arith.addi %8, %10 : vector<8x1xi32>
    %c8_i32_3 = arith.constant 8 : i32
    %12 = vector.broadcast %c8_i32_3 : i32 to vector<8x1xi32>
    %13 = arith.cmpi slt, %11, %12 : vector<8x1xi32>
    %14 = vector.broadcast %7 : vector<1x128xi1> to vector<8x128xi1>
    %15 = vector.broadcast %13 : vector<8x1xi1> to vector<8x128xi1>
    %16 = arith.andi %14, %15 : vector<8x128xi1>
    %cst = arith.constant 0.000000e+00 : f32
    %17 = vector.broadcast %cst : f32 to vector<8x128xf32>
    %18 = arith.select %16, %0, %17 : vector<8x128xi1>, vector<8x128xf32>
    %cst_4 = arith.constant 0.000000e+00 : f32
    %19 = vector.broadcast %cst_4 : f32 to vector<8x128xf32>
    %20 = arith.select %16, %1, %19 : vector<8x128xi1>, vector<8x128xf32>
    %21 = arith.subf %18, %20 : vector<8x128xf32>
    %22 = math.absf %20 : vector<8x128xf32>
    %cst_5 = arith.constant 9.99999997E-7 : f32
    %23 = vector.broadcast %cst_5 : f32 to vector<8x128xf32>
    %24 = arith.addf %22, %23 : vector<8x128xf32>
    %25 = tpu.reciprocal %24 {approx = true} : vector<8x128xf32> -> vector<8x128xf32>
    %26 = arith.mulf %24, %25 : vector<8x128xf32>
    %cst_6 = arith.constant 2.000000e+00 : f32
    %27 = vector.broadcast %cst_6 : f32 to vector<8x128xf32>
    %28 = arith.subf %27, %26 : vector<8x128xf32>
    %29 = arith.mulf %25, %28 : vector<8x128xf32>
    %30 = arith.mulf %21, %21 : vector<8x128xf32>
    %cst_7 = arith.constant dense<0.000000e+00> : vector<128xf32>
    %31 = vector.multi_reduction <add>, %30, %cst_7 [0] : vector<8x128xf32> to vector<128xf32>
    %32 = vector.shape_cast %31 : vector<128xf32> to vector<1x128xf32>
    %33 = math.absf %21 : vector<8x128xf32>
    %34 = arith.mulf %33, %29 : vector<8x128xf32>
    %cst_8 = arith.constant dense<0.000000e+00> : vector<128xf32>
    %35 = vector.multi_reduction <add>, %34, %cst_8 [0] : vector<8x128xf32> to vector<128xf32>
    %36 = vector.shape_cast %35 : vector<128xf32> to vector<1x128xf32>
    %c7_i32 = arith.constant 7 : i32
    %37 = tpu.dynamic_rotate %21 by %c7_i32 dim 0 : vector<8x128xf32>, i32 -> vector<8x128xf32>
    %38 = arith.subf %37, %21 : vector<8x128xf32>
    %c7_i32_9 = arith.constant 7 : i32
    %39 = vector.broadcast %c7_i32_9 : i32 to vector<8x1xi32>
    %40 = arith.cmpi slt, %8, %39 : vector<8x1xi32>
    %c1_i32 = arith.constant 1 : i32
    %41 = vector.broadcast %c1_i32 : i32 to vector<8x1xi32>
    %42 = arith.addi %11, %41 : vector<8x1xi32>
    %c8_i32_10 = arith.constant 8 : i32
    %43 = vector.broadcast %c8_i32_10 : i32 to vector<8x1xi32>
    %44 = arith.cmpi slt, %42, %43 : vector<8x1xi32>
    %45 = arith.andi %40, %44 : vector<8x1xi1>
    %46 = arith.mulf %38, %38 : vector<8x128xf32>
    %cst_11 = arith.constant 0.000000e+00 : f32
    %47 = vector.shape_cast %45 : vector<8x1xi1> to vector<8x1xi1>
    %48 = vector.broadcast %47 : vector<8x1xi1> to vector<8x128xi1>
    %49 = vector.broadcast %cst_11 : f32 to vector<8x128xf32>
    %50 = arith.select %48, %46, %49 : vector<8x128xi1>, vector<8x128xf32>
    %cst_12 = arith.constant dense<0.000000e+00> : vector<128xf32>
    %51 = vector.multi_reduction <add>, %50, %cst_12 [0] : vector<8x128xf32> to vector<128xf32>
    %52 = vector.shape_cast %51 : vector<128xf32> to vector<1x128xf32>
    %c0_i32 = arith.constant 0 : i32
    %53 = arith.cmpi eq, %arg1, %c0_i32 : i32
    %54 = arith.extui %53 : i1 to i32
    %c0_i32_13 = arith.constant 0 : i32
    %55 = arith.cmpi ne, %54, %c0_i32_13 : i32
    scf.if %55 {
      %cst_28 = arith.constant 0.000000e+00 : f32
      %70 = vector.broadcast %cst_28 : f32 to vector<3x128xf32>
      %c0_29 = arith.constant 0 : index
      %c0_30 = arith.constant 0 : index
      %71 = vector.load %arg4[%c0_29, %c0_30] : memref<3x128xf32, #tpu.memory_space<vmem>>, vector<3x128xf32>
      tpu.vector_store %arg4[%c0_29, %c0_30], %70 {strides = array<i32>} : memref<3x128xf32, #tpu.memory_space<vmem>>, vector<3x128xf32>,
    } else {
    }
    %c0_14 = arith.constant 0 : index
    %c0_15 = arith.constant 0 : index
    %56 = vector.load %arg4[%c0_14, %c0_15] : memref<3x128xf32, #tpu.memory_space<vmem>>, vector<1x128xf32>
    %57 = arith.addf %56, %32 : vector<1x128xf32>
    %c0_16 = arith.constant 0 : index
    %c0_17 = arith.constant 0 : index
    %58 = vector.load %arg4[%c0_16, %c0_17] : memref<3x128xf32, #tpu.memory_space<vmem>>, vector<1x128xf32>
    tpu.vector_store %arg4[%c0_16, %c0_17], %57 {strides = array<i32>} : memref<3x128xf32, #tpu.memory_space<vmem>>, vector<1x128xf32>,
    %c1 = arith.constant 1 : index
    %c0_18 = arith.constant 0 : index
    %59 = vector.load %arg4[%c1, %c0_18] : memref<3x128xf32, #tpu.memory_space<vmem>>, vector<1x128xf32>
    %60 = arith.addf %59, %36 : vector<1x128xf32>
    %c1_19 = arith.constant 1 : index
    %c0_20 = arith.constant 0 : index
    %61 = vector.load %arg4[%c1_19, %c0_20] : memref<3x128xf32, #tpu.memory_space<vmem>>, vector<1x128xf32>
    tpu.vector_store %arg4[%c1_19, %c0_20], %60 {strides = array<i32>} : memref<3x128xf32, #tpu.memory_space<vmem>>, vector<1x128xf32>,
    %c2 = arith.constant 2 : index
    %c0_21 = arith.constant 0 : index
    %62 = vector.load %arg4[%c2, %c0_21] : memref<3x128xf32, #tpu.memory_space<vmem>>, vector<1x128xf32>
    %63 = arith.addf %62, %52 : vector<1x128xf32>
    %c2_22 = arith.constant 2 : index
    %c0_23 = arith.constant 0 : index
    %64 = vector.load %arg4[%c2_22, %c0_23] : memref<3x128xf32, #tpu.memory_space<vmem>>, vector<1x128xf32>
    tpu.vector_store %arg4[%c2_22, %c0_23], %63 {strides = array<i32>} : memref<3x128xf32, #tpu.memory_space<vmem>>, vector<1x128xf32>,
    %c0_i32_24 = arith.constant 0 : i32
    %65 = arith.cmpi sgt, %arg1, %c0_i32_24 : i32
    %66 = arith.extui %65 : i1 to i32
    %c0_i32_25 = arith.constant 0 : i32
    %67 = arith.cmpi ne, %66, %c0_i32_25 : i32
    scf.if %67 {
      %70 = vector.extract_strided_slice %21 {offsets = [0, 0], sizes = [1, 128], strides = [1, 1]} : vector<8x128xf32> to vector<1x128xf32>
      %c0_28 = arith.constant 0 : index
      %c0_29 = arith.constant 0 : index
      %71 = vector.load %arg5[%c0_28, %c0_29] : memref<1x128xf32, #tpu.memory_space<vmem>>, vector<1x128xf32>
      %72 = arith.subf %70, %71 : vector<1x128xf32>
      %c2_30 = arith.constant 2 : index
      %c0_31 = arith.constant 0 : index
      %73 = vector.load %arg4[%c2_30, %c0_31] : memref<3x128xf32, #tpu.memory_space<vmem>>, vector<1x128xf32>
      %74 = arith.mulf %72, %72 : vector<1x128xf32>
      %75 = arith.addf %73, %74 : vector<1x128xf32>
      %c2_32 = arith.constant 2 : index
      %c0_33 = arith.constant 0 : index
      %76 = vector.load %arg4[%c2_32, %c0_33] : memref<3x128xf32, #tpu.memory_space<vmem>>, vector<1x128xf32>
      tpu.vector_store %arg4[%c2_32, %c0_33], %75 {strides = array<i32>} : memref<3x128xf32, #tpu.memory_space<vmem>>, vector<1x128xf32>,
    } else {
    }
    %68 = vector.extract_strided_slice %21 {offsets = [7, 0], sizes = [1, 128], strides = [1, 1]} : vector<8x128xf32> to vector<1x128xf32>
    %c0_26 = arith.constant 0 : index
    %c0_27 = arith.constant 0 : index
    %69 = vector.load %arg5[%c0_26, %c0_27] : memref<1x128xf32, #tpu.memory_space<vmem>>, vector<1x128xf32>
    tpu.vector_store %arg5[%c0_26, %c0_27], %68 {strides = array<i32>} : memref<1x128xf32, #tpu.memory_space<vmem>>, vector<1x128xf32>,
    return
  }
  func.func @transform_0(%arg0: i32, %arg1: i32) -> (i32, i32) {
    %c0_i32 = arith.constant 0 : i32
    return %arg1, %arg0 : i32, i32
  }
  func.func @transform_1(%arg0: i32, %arg1: i32) -> (i32, i32) {
    %c0_i32 = arith.constant 0 : i32
    return %arg1, %arg0 : i32, i32
  }
  func.func @transform_2(%arg0: i32, %arg1: i32) -> (i32, i32) {
    %c0_i32 = arith.constant 0 : i32
    %c0_i32_0 = arith.constant 0 : i32
    return %c0_i32, %arg0 : i32, i32
  }
}

</mosaic_0001>

<bundles_post_ra>
// kernel: tpu_custom_call.1
= control target key start
LH: loop header
LB: loop body
LE: loop exit
PB: predicated region body
PF: predicated region fallthrough
CT: control target
= control target key end

     0   :  { %7 = vsyncpa [#allocation4], 0  ;;  %s254_s0 = inlined_call_operand.hbm [shape: f32[8,64], index: 0, kind: input, shape index: {}]   ;;  %s255_s1 = inlined_call_operand.hbm [shape: f32[8,64], index: 1, kind: input, shape index: {}]   ;;  %s256_s2 = inlined_call_operand.hbm [shape: f32[3,128], index: 2, kind: output, shape index: {}]  }
   0x1   :  { %8 = vsyncpa [#allocation7], 0 }
   0x2   :  { %9 = vsyncpa [#allocation5], 0  ;;  %s15_s11 = sshll.u32 %s254_s0, 4  ;;  %s226_s12 = smov [#allocation3]   ;;  %s16_s11 = int_to_ptr.hbm [resolvable:$true] %s15_s11 }
   0x3   :  { %s17_s13 = sshll.u32 %s226_s12, 4  ;;  %s26_s16 = sshll.u32 %s255_s1, 4  ;;  %s18_s13 = int_to_ptr.vmem [resolvable:$true] %s17_s13  ;;  %s27_s16 = int_to_ptr.hbm [resolvable:$true] %s26_s16 }
   0x4   :  { %20 = dma.hbm_to_vmem [thread:$0]  %s16_s11, 128, %s18_s13, [#allocation4]  }
   0x5   :  { %s227_s17 = smov [#allocation6]  }
   0x6   :  { %s28_s18 = sshll.u32 %s227_s17, 4  ;;  %s29_s18 = int_to_ptr.vmem [resolvable:$true] %s28_s18 }
   0x7   :  { %31 = dma.hbm_to_vmem [thread:$0]  %s27_s16, 128, %s29_s18, [#allocation7]  }
   0x8   :  { %220 = dma.done.wait [#allocation4], 128  }
   0x9   :  { %221 = vsyncadd [#allocation4], 4294967168 }
   0xa   :  { %222 = dma.done.wait [#allocation7], 128  }
   0xb   :  { %223 = vsyncadd [#allocation7], 4294967168  ;;  %v42_v0 = vlaneseq  ;;  %v228_v1 = vmov 0.0   ;;  %v40_v4 = vld [vmem:[#allocation3] sm:$0xff]  ;;  %v41_v5 = vld [vmem:[#allocation6] sm:$0xff]  ;;  %s229_s0 = smov [#allocation8]  }
   0xc   :  { %103 = vst [vmem:[#allocation8] sm:$0x7] %v228_v1  ;;  %s129_s1 = sshll.u32 %s229_s0, 4  ;;  %s131_s21 = sshll.u32 %s256_s2, 4  ;;  %s130_s1 = int_to_ptr.vmem [resolvable:$true] %s129_s1  ;;  %s132_s21 = int_to_ptr.hbm [resolvable:$true] %s131_s21 }
   0xd   :  { %v43_v2 = vand.u32 127, %v42_v0  ;;  %v49_v3 = vshrl.u32 %v42_v0, 7 }
   0xf   :  { %vm47_vm0 = vcmp.lt.s32.totalorder %v43_v2, 64  ;;  %v86_v8 = vadd.s32 1, %v49_v3  ;;  %vm85_vm1 = vcmp.lt.s32.totalorder %v49_v3, 7 }
  0x10   :  { %v59_v6 = vsel %vm47_vm0, %v40_v4, 0.0  ;;  %v60_v7 = vsel %vm47_vm0, %v41_v5, 0.0 }
  0x11   :  { %v61_v9 = vsub.f32 %v59_v6, %v60_v7  ;;  %v62_v10 = vand.u32 2147483647, %v60_v7  ;;  %vm87_vm2 = vcmp.lt.s32.totalorder %v86_v8, 8 }
  0x12   :  { %vm88_vm3 = vmand %vm85_vm1, %vm87_vm2 }
  0x13   :  { %v68_v11 = vmul.f32 %v61_v9, %v61_v9  ;;  %v63_v12 = vadd.f32 1e-06, %v62_v10  ;;  %v83_v13 = vrot.slane %v61_v9, 1  ;;  %v104_v26 = vld [vmem:[#allocation8] sm:$0x1] }
  0x14   :  { %v75_v28 = vand.u32 2147483647, %v61_v9  ;;  %v110_v37 = vld [vmem:[#allocation8 + $0x2] sm:$0x1]  ;;  %v107_v44 = vld [vmem:[#allocation8 + $0x1] sm:$0x1] }
  0x15   :  { %v69_v14 = vrot.slane %v68_v11, 4  ;;  %146 = vrcp.f32 %v63_v12  ;;  %v84_v15 = vsub.f32 %v83_v13, %v61_v9 }
  0x17   :  { %v70_v16 = vadd.f32 %v69_v14, %v68_v11  ;;  %v89_v17 = vmul.f32 %v84_v15, %v84_v15 }
  0x19   :  { %v71_v18 = vrot.slane %v70_v16, 2  ;;  %v92_v19 = vsel %vm88_vm3, %v89_v17, 0.0 }
  0x1a   :  { %v93_v22 = vrot.slane %v92_v19, 4 }
  0x1b   :  { %v147_v20 = vpop.eup %146  ;;  %v72_v21 = vadd.f32 %v71_v18, %v70_v16 }
  0x1c   :  { %v65_v23 = vmul.f32 %v147_v20, %v63_v12  ;;  %v94_v25 = vadd.f32 %v93_v22, %v92_v19 }
  0x1d   :  { %v73_v24 = vrot.slane %v72_v21, 1 }
  0x1e   :  { %v66_v27 = vsub.f32 2.0, %v65_v23  ;;  %v95_v30 = vrot.slane %v94_v25, 2 }
  0x1f   :  { %v74_v29 = vadd.f32 %v73_v24, %v72_v21 }
  0x20   :  { %v67_v31 = vmul.f32 %v147_v20, %v66_v27  ;;  %v96_v33 = vadd.f32 %v95_v30, %v94_v25 }
  0x21   :  { %v105_v32 = vadd.f32 %v104_v26, %v74_v29 }
  0x22   :  { %v76_v34 = vmul.f32 %v75_v28, %v67_v31  ;;  %v97_v35 = vrot.slane %v96_v33, 1 }
  0x23   :  { %106 = vst [vmem:[#allocation8] sm:$0x1] %v105_v32 }
  0x24   :  { %v77_v36 = vrot.slane %v76_v34, 4  ;;  %v98_v38 = vadd.f32 %v97_v35, %v96_v33 }
  0x26   :  { %v78_v39 = vadd.f32 %v77_v36, %v76_v34  ;;  %v111_v40 = vadd.f32 %v110_v37, %v98_v38 }
  0x28   :  { %v79_v41 = vrot.slane %v78_v39, 2  ;;  %112 = vst [vmem:[#allocation8 + $0x2] sm:$0x1] %v111_v40 }
  0x2a   :  { %v80_v42 = vadd.f32 %v79_v41, %v78_v39 }
  0x2c   :  { %v81_v43 = vrot.slane %v80_v42, 1 }
  0x2e   :  { %v82_v45 = vadd.f32 %v81_v43, %v80_v42 }
  0x30   :  { %v108_v46 = vadd.f32 %v107_v44, %v82_v45 }
  0x32   :  { %109 = vst [vmem:[#allocation8 + $0x1] sm:$0x1] %v108_v46 }
  0x33   :  { %134 = dma.vmem_to_hbm [thread:$0]  %s130_s1, 64, %s132_s21, [#allocation5]  }
  0x34   :  { %224 = dma.done.wait [#allocation5], 64  }
  0x35   :  { %225 = vsyncadd [#allocation5], 4294967232 }
  0x36   :  { %139 = vsyncpa [#allocation4], 1 }
  0x37   :  { %140 = vsyncpa [#allocation7], 1 }
  0x38   :  { %141 = vsyncpa [#allocation5], 1 }

</bundles_post_ra>
